<compile_context>
chip_gen: v7x
topology: tpu7x:2x2x1
jax: 0.10.0
libtpu: 0.0.40
codegen_flags: <defaults>
</compile_context>

<pallas_src>
import math

import jax
import jax.numpy as jnp
from jax import lax
from jax.experimental import pallas as pl
from jax.experimental.pallas import tpu as pltpu


# Param-pack column indices: one (H, 6) block replaces many tiny (1,H) DMAs.
_B1, _S1, _B2, _S2, _W3, _B3 = range(6)
_NCOLS = 6


# ----------------------------------------------------------------------------
# Pallas kernel: whole MLP for one batch tile.
# Layout: features on sublanes, batch on lanes (lane-dense output).
# ----------------------------------------------------------------------------
def _discriminator_fc_kernel(xT_ref, w1T_ref, w2T_ref, pack_ref, o_ref):
    b1 = pack_ref[:, _B1:_B1 + 1]      # (H, 1)
    s1 = pack_ref[:, _S1:_S1 + 1]      # (H, 1)  Swish scale = 1 + beta
    b2 = pack_ref[:, _B2:_B2 + 1]      # (H, 1)  BN1-folded bias
    s2 = pack_ref[:, _S2:_S2 + 1]      # (H, 1)
    w3 = pack_ref[:, _W3:_W3 + 1]      # (H, 1)  BN2-folded final weight
    b3 = pack_ref[0:1, _B3:_B3 + 1]    # (1, 1)  BN2-folded final bias

    def swish(h, s):
        # h * sigmoid(s*h): exp and approx reciprocal both use the EUP slot,
        # keeping the VALU slot free for the multiplies.
        return h * pl.reciprocal(1.0 + jnp.exp(-s * h), approx=True)

    xT = xT_ref[...].astype(jnp.float32)                                      # (nstyle, TB)

    # Linear(nstyle -> H) + Swish.  (GradientReversal is identity in forward.)
    h = jnp.dot(w1T_ref[...], xT, preferred_element_type=jnp.float32) + b1    # (H, TB)
    h = swish(h, s1)
    # BatchNorm1d #1 (eval, affine=False) folded into w2/b2 at trace time.
    h = jnp.dot(w2T_ref[...], h, preferred_element_type=jnp.float32) + b2     # (H, TB)
    h = swish(h, s2)
    # BatchNorm1d #2 folded into w3/b3. Final Linear(H -> 1): VPU multiply +
    # sublane reduce -> lane-dense (1, TB) result (unmasked store).
    o_ref[...] = (jnp.sum(h * w3, axis=0, keepdims=True) + b3).astype(o_ref.dtype)


# ----------------------------------------------------------------------------
# Wrapper: trace-time constant folding + batch tiling.
# ----------------------------------------------------------------------------
def discriminator_fc_forward(x, params, eps=1e-5, tb=256):
    """Eval-mode forward of DiscriminatorFC.  x: (B, nstyle) -> (B, 1)."""
    assert tb % 128 == 0, "multi-tile lane block must be a multiple of 128"
    B, nstyle = x.shape
    H = params["w1"].shape[1]
    f32 = jnp.float32

    # ---- trace-time constant folding on (H,)-sized eval-mode constants ----
    r1 = lax.rsqrt(params["v1"].astype(f32) + eps)
    r2 = lax.rsqrt(params["v2"].astype(f32) + eps)
    w2f = params["w2"].astype(f32) * r1[:, None]                       # BN1 into Linear2
    b2f = params["b2"].astype(f32) - (params["m1"].astype(f32) * r1) @ params["w2"].astype(f32)
    w3v = params["w3"].astype(f32).reshape(H)
    w3f = w3v * r2                                                     # BN2 into Linear3
    b3f = params["b3"].astype(f32).reshape(()) - jnp.dot(params["m2"].astype(f32) * r2, w3v)
    s1 = 1.0 + params["sb1"].astype(f32)                               # Swish scales
    s2 = 1.0 + params["sb2"].astype(f32)

    pack = jnp.stack(
        [params["b1"].astype(f32), s1, b2f, s2, w3f, jnp.full((H,), b3f, f32)],
        axis=1)                                                        # (H, 6)
    w1T = params["w1"].astype(f32).T                                   # (H, nstyle)
    w2Tf = w2f.T                                                       # (H, H)

    # ---- batch tiling: batch sits on the lane axis ----
    if B <= tb:
        TB, B_pad = B, B
    else:
        TB = tb
        B_pad = ((B + TB - 1) // TB) * TB
    num_tiles = B_pad // TB

    xT = x.astype(f32).T                                               # (nstyle, B)
    if B_pad != B:
        xT = jnp.pad(xT, ((0, 0), (0, B_pad - B)))

    flops = 2 * B_pad * (nstyle * H + H * H + H) + 10 * B_pad * H
    bytes_accessed = 4 * (int(xT.size) + int(w1T.size) + int(w2Tf.size) + int(pack.size) + B_pad)

    out = pl.pallas_call(
        _discriminator_fc_kernel,
        out_shape=jax.ShapeDtypeStruct((1, B_pad), f32),
        grid=(num_tiles,),
        in_specs=[
            pl.BlockSpec((nstyle, TB), lambda i: (0, i)),      # x: batch-tiled along lanes
            pl.BlockSpec((H, nstyle), lambda i: (0, 0)),       # weights: constant index map
            pl.BlockSpec((H, H), lambda i: (0, 0)),            #   -> stay VMEM-resident
            pl.BlockSpec((H, _NCOLS), lambda i: (0, 0)),       # single packed param block
        ],
        out_specs=pl.BlockSpec((1, TB), lambda i: (0, i)),     # lane-dense output tile
        compiler_params=pltpu.CompilerParams(
            # Batch tiles are independent -> shard across v7x's 2 TensorCores.
            dimension_semantics=("parallel",)),
        cost_estimate=pl.CostEstimate(
            flops=int(flops),
            transcendentals=int(4 * B_pad * H),
            bytes_accessed=int(bytes_accessed)),
    )(xT, w1T, w2Tf, pack)

    return out[0, :B].reshape(B, 1).astype(x.dtype)


# ----------------------------------------------------------------------------
# Pure-JAX reference (unfused, exact sigmoid) for verification.
# ----------------------------------------------------------------------------
def discriminator_fc_ref(x, params, eps=1e-5):
    def sigmoid(z):
        return 1.0 / (1.0 + jnp.exp(-z))

    hp = lax.Precision.HIGHEST
    h = jnp.dot(x, params["w1"], precision=hp) + params["b1"]
    h = h * sigmoid((1.0 + params["sb1"]) * h)
    h = (h - params["m1"]) / jnp.sqrt(params["v1"] + eps)
    h = jnp.dot(h, params["w2"], precision=hp) + params["b2"]
    h = h * sigmoid((1.0 + params["sb2"]) * h)
    h = (h - params["m2"]) / jnp.sqrt(params["v2"] + eps)
    return jnp.dot(h, params["w3"], precision=hp) + params["b3"]


if __name__ == "__main__":
    NSTYLE, HIDDEN = 5, 64   # module defaults: nstyle=5, hiden_size=64, layers=3

    def make_params(key):
        ks = jax.random.split(key, 10)

        def linear_init(kw, kb, fan_in, fan_out):
            bound = 1.0 / math.sqrt(fan_in)
            w = jax.random.uniform(kw, (fan_in, fan_out), minval=-bound, maxval=bound,
                                   dtype=jnp.float32)
            b = jax.random.uniform(kb, (fan_out,), minval=-bound, maxval=bound,
                                   dtype=jnp.float32)
            return w, b

        w1, b1 = linear_init(ks[0], ks[1], NSTYLE, HIDDEN)
        w2, b2 = linear_init(ks[2], ks[3], HIDDEN, HIDDEN)
        w3, b3 = linear_init(ks[4], ks[5], HIDDEN, 1)
        return dict(
            w1=w1, b1=b1,
            sb1=jnp.full((HIDDEN,), 3.0, jnp.float32),   # Swish init=1.0 -> beta = 4*1 - 1
            m1=0.1 * jax.random.normal(ks[6], (HIDDEN,), dtype=jnp.float32),
            v1=jax.random.uniform(ks[7], (HIDDEN,), minval=0.5, maxval=1.5, dtype=jnp.float32),
            w2=w2, b2=b2,
            sb2=jnp.full((HIDDEN,), 3.0, jnp.float32),
            m2=0.1 * jax.random.normal(ks[8], (HIDDEN,), dtype=jnp.float32),
            v2=jax.random.uniform(ks[9], (HIDDEN,), minval=0.5, maxval=1.5, dtype=jnp.float32),
            w3=w3, b3=b3)

    key = jax.random.PRNGKey(0)
    kp, kx1, kx2 = jax.random.split(key, 3)
    params = make_params(kp)

    # Tolerance is slightly above 1e-3 to absorb the approx-EUP-reciprocal sigmoid drift.
    ATOL = RTOL = 3e-3

    # Small batch: single-tile path (whole batch on the lane axis).
    x_small = jax.random.normal(kx1, (8, NSTYLE), dtype=jnp.float32)
    out_s = jax.block_until_ready(discriminator_fc_forward(x_small, params))
    ref_s = discriminator_fc_ref(x_small, params)
    assert out_s.shape == (8, 1), out_s.shape
    assert jnp.allclose(out_s, ref_s, atol=ATOL, rtol=RTOL), (out_s, ref_s)

    # Larger batch: exercises the batch-tiled grid (TB=256, padded) + parallel axis.
    x_big = jax.random.normal(kx2, (300, NSTYLE), dtype=jnp.float32)
    out_b = jax.block_until_ready(discriminator_fc_forward(x_big, params))
    ref_b = discriminator_fc_ref(x_big, params)
    assert out_b.shape == (300, 1), out_b.shape
    assert jnp.allclose(out_b, ref_b, atol=ATOL, rtol=RTOL), (out_b, ref_b)

    print("KERNEL_OK")
</pallas_src>

<mosaic_0001>
module attributes {stable_mosaic.version = 11 : i64} {
  func.func @_discriminator_fc_kernel(%arg0: i32, %arg1: memref<5x8xf32, #tpu.memory_space<vmem>>, %arg2: memref<64x5xf32, #tpu.memory_space<vmem>>, %arg3: memref<64x64xf32, #tpu.memory_space<vmem>>, %arg4: memref<64x6xf32, #tpu.memory_space<vmem>>, %arg5: memref<1x8xf32, #tpu.memory_space<vmem>>) attributes {dimension_semantics = [#tpu.dimension_semantics<parallel>], iteration_bounds = array<i64: 1>, scalar_prefetch = 0 : i64, scratch_operands = 0 : i64, tpu.core_type = #tpu.core_type<tc>, window_params = [{transform_indices = @transform_0, window_bounds = array<i64: 5, 8>}, {pipeline_mode = #tpu.pipeline_mode<synchronous>, transform_indices = @transform_1, window_bounds = array<i64: 64, 5>}, {pipeline_mode = #tpu.pipeline_mode<synchronous>, transform_indices = @transform_2, window_bounds = array<i64: 64, 64>}, {pipeline_mode = #tpu.pipeline_mode<synchronous>, transform_indices = @transform_3, window_bounds = array<i64: 64, 6>}, {transform_indices = @transform_4, window_bounds = array<i64: 1, 8>}]} {
    %c0 = arith.constant 0 : index
    %c0_0 = arith.constant 0 : index
    %0 = vector.load %arg4[%c0, %c0_0] : memref<64x6xf32, #tpu.memory_space<vmem>>, vector<64x1xf32>
    %c0_1 = arith.constant 0 : index
    %c1 = arith.constant 1 : index
    %1 = vector.load %arg4[%c0_1, %c1] : memref<64x6xf32, #tpu.memory_space<vmem>>, vector<64x1xf32>
    %c0_2 = arith.constant 0 : index
    %c2 = arith.constant 2 : index
    %2 = vector.load %arg4[%c0_2, %c2] : memref<64x6xf32, #tpu.memory_space<vmem>>, vector<64x1xf32>
    %c0_3 = arith.constant 0 : index
    %c3 = arith.constant 3 : index
    %3 = vector.load %arg4[%c0_3, %c3] : memref<64x6xf32, #tpu.memory_space<vmem>>, vector<64x1xf32>
    %c0_4 = arith.constant 0 : index
    %c4 = arith.constant 4 : index
    %4 = vector.load %arg4[%c0_4, %c4] : memref<64x6xf32, #tpu.memory_space<vmem>>, vector<64x1xf32>
    %c0_5 = arith.constant 0 : index
    %c5 = arith.constant 5 : index
    %5 = vector.load %arg4[%c0_5, %c5] : memref<64x6xf32, #tpu.memory_space<vmem>>, vector<1x1xf32>
    %c0_6 = arith.constant 0 : index
    %c0_7 = arith.constant 0 : index
    %6 = vector.load %arg1[%c0_6, %c0_7] : memref<5x8xf32, #tpu.memory_space<vmem>>, vector<5x8xf32>
    %c0_8 = arith.constant 0 : index
    %c0_9 = arith.constant 0 : index
    %7 = vector.load %arg2[%c0_8, %c0_9] : memref<64x5xf32, #tpu.memory_space<vmem>>, vector<64x5xf32>
    %cst = arith.constant dense<0.000000e+00> : vector<64x8xf32>
    %8 = tpu.matmul %7, %6, %cst {dimension_numbers = #tpu.dot_dimension_numbers<[1], [0], [0], [1], [0, 0, 1, 1], [], []>} : vector<64x5xf32>, vector<5x8xf32>, vector<64x8xf32> -> vector<64x8xf32>
    %9 = vector.broadcast %0 : vector<64x1xf32> to vector<64x8xf32>
    %10 = arith.addf %8, %9 : vector<64x8xf32>
    %cst_10 = arith.constant 0.000000e+00 : f32
    %11 = vector.broadcast %cst_10 : f32 to vector<64x1xf32>
    %12 = arith.subf %11, %1 : vector<64x1xf32>
    %13 = vector.broadcast %12 : vector<64x1xf32> to vector<64x8xf32>
    %14 = arith.mulf %13, %10 : vector<64x8xf32>
    %15 = math.exp %14 : vector<64x8xf32>
    %cst_11 = arith.constant 1.000000e+00 : f32
    %16 = vector.broadcast %cst_11 : f32 to vector<64x8xf32>
    %17 = arith.addf %16, %15 : vector<64x8xf32>
    %18 = tpu.reciprocal %17 {approx = true} : vector<64x8xf32> -> vector<64x8xf32>
    %19 = arith.mulf %10, %18 : vector<64x8xf32>
    %c0_12 = arith.constant 0 : index
    %c0_13 = arith.constant 0 : index
    %20 = vector.load %arg3[%c0_12, %c0_13] : memref<64x64xf32, #tpu.memory_space<vmem>>, vector<64x64xf32>
    %cst_14 = arith.constant dense<0.000000e+00> : vector<64x8xf32>
    %21 = tpu.matmul %20, %19, %cst_14 {dimension_numbers = #tpu.dot_dimension_numbers<[1], [0], [0], [1], [0, 0, 1, 1], [], []>} : vector<64x64xf32>, vector<64x8xf32>, vector<64x8xf32> -> vector<64x8xf32>
    %22 = vector.broadcast %2 : vector<64x1xf32> to vector<64x8xf32>
    %23 = arith.addf %21, %22 : vector<64x8xf32>
    %cst_15 = arith.constant 0.000000e+00 : f32
    %24 = vector.broadcast %cst_15 : f32 to vector<64x1xf32>
    %25 = arith.subf %24, %3 : vector<64x1xf32>
    %26 = vector.broadcast %25 : vector<64x1xf32> to vector<64x8xf32>
    %27 = arith.mulf %26, %23 : vector<64x8xf32>
    %28 = math.exp %27 : vector<64x8xf32>
    %cst_16 = arith.constant 1.000000e+00 : f32
    %29 = vector.broadcast %cst_16 : f32 to vector<64x8xf32>
    %30 = arith.addf %29, %28 : vector<64x8xf32>
    %31 = tpu.reciprocal %30 {approx = true} : vector<64x8xf32> -> vector<64x8xf32>
    %32 = arith.mulf %23, %31 : vector<64x8xf32>
    %33 = vector.broadcast %4 : vector<64x1xf32> to vector<64x8xf32>
    %34 = arith.mulf %32, %33 : vector<64x8xf32>
    %cst_17 = arith.constant dense<0.000000e+00> : vector<8xf32>
    %35 = vector.multi_reduction <add>, %34, %cst_17 [0] : vector<64x8xf32> to vector<8xf32>
    %36 = vector.shape_cast %35 : vector<8xf32> to vector<1x8xf32>
    %37 = vector.broadcast %5 : vector<1x1xf32> to vector<1x8xf32>
    %38 = arith.addf %36, %37 : vector<1x8xf32>
    %c0_18 = arith.constant 0 : index
    %c0_19 = arith.constant 0 : index
    %39 = vector.load %arg5[%c0_18, %c0_19] : memref<1x8xf32, #tpu.memory_space<vmem>>, vector<1x8xf32>
    tpu.vector_store %arg5[%c0_18, %c0_19], %38 {strides = array<i32>} : memref<1x8xf32, #tpu.memory_space<vmem>>, vector<1x8xf32>,
    return
  }
  func.func @transform_0(%arg0: i32) -> (i32, i32) {
    %c0_i32 = arith.constant 0 : i32
    %c0_i32_0 = arith.constant 0 : i32
    return %c0_i32, %arg0 : i32, i32
  }
  func.func @transform_1(%arg0: i32) -> (i32, i32) {
    %c0_i32 = arith.constant 0 : i32
    %c0_i32_0 = arith.constant 0 : i32
    %c0_i32_1 = arith.constant 0 : i32
    return %c0_i32, %c0_i32_0 : i32, i32
  }
  func.func @transform_2(%arg0: i32) -> (i32, i32) {
    %c0_i32 = arith.constant 0 : i32
    %c0_i32_0 = arith.constant 0 : i32
    %c0_i32_1 = arith.constant 0 : i32
    return %c0_i32, %c0_i32_0 : i32, i32
  }
  func.func @transform_3(%arg0: i32) -> (i32, i32) {
    %c0_i32 = arith.constant 0 : i32
    %c0_i32_0 = arith.constant 0 : i32
    %c0_i32_1 = arith.constant 0 : i32
    return %c0_i32, %c0_i32_0 : i32, i32
  }
  func.func @transform_4(%arg0: i32) -> (i32, i32) {
    %c0_i32 = arith.constant 0 : i32
    %c0_i32_0 = arith.constant 0 : i32
    return %c0_i32, %arg0 : i32, i32
  }
}

</mosaic_0001>

<bundles_post_ra>
// kernel: tpu_custom_call.1
= control target key start
LH: loop header
LB: loop body
LE: loop exit
PB: predicated region body
PF: predicated region fallthrough
CT: control target
= control target key end

     0   :  { %vm101_vm0 = vcmask 1044480   ;;  %vm76_vm1 = vcmask 39936   ;;  %v866_v4 = vmov 1   ;;  %s1106_s0 = inlined_call_operand.vmem [shape: f32[5,8], index: 0, kind: input, shape index: {}]   ;;  %s1107_s1 = inlined_call_operand.vmem [shape: f32[64,5], index: 1, kind: input, shape index: {}]   ;;  %s1108_s2 = inlined_call_operand.vmem [shape: f32[64,64], index: 2, kind: input, shape index: {}]   ;;  %s1109_s3 = inlined_call_operand.vmem [shape: f32[64,6], index: 3, kind: input, shape index: {}]   ;;  %s1110_s4 = inlined_call_operand.hbm [shape: f32[1,8], index: 4, kind: output, shape index: {}]  }
   0x1   :  { %v27_v0 = vld [vmem:[%s1106_s0] sm:$0x1f]  ;;  %v29_v2 = vld [vmem:[%s1107_s1 + $0x8] sm:$0xff]  ;;  %v30_v3 = vld [vmem:[%s1107_s1 + $0x10] sm:$0xff]  ;;  %757 = vset.pattern.permute.xlu0 %v866_v4  ;;  %755 = vset.pattern.permute.xlu1 %v866_v4 }
   0x2   :  { %v28_v1 = vld [vmem:[%s1107_s1] sm:$0xff]  ;;  %682 = vmatprep.subr.msk.mxu0 %vm101_vm0, %v27_v0  ;;  %v915_v5 = vld [vmem:[%s1109_s3 + $0x10] sm:$0xff]  ;;  %v925_v7 = vld [vmem:[%s1109_s3 + $0x8] sm:$0xff] }
   0x3   :  { %684 = vmatprep.mubr.msk.f32.mxu0 %vm76_vm1, %v28_v1  ;;  %683 = vmatpush3.msk.msra.mxu0 %vm101_vm0, %v27_v0  ;;  %v920_v6 = vld [vmem:[%s1109_s3] sm:$0xff]  ;;  %v31_v8 = vld [vmem:[%s1107_s1 + $0x18] sm:$0xff]  ;;  %v212_v9 = vsub.f32 0.0, %v915_v5  ;;  %v211_v12 = vsub.f32 0.0, %v925_v7 }
   0x4   :  { %685 = vmatmul.mubr.msk.f32.vlgmr.msra.gmra.mrb[0].mxu0 %vm76_vm1, %v29_v2  ;;  %v210_v10 = vsub.f32 0.0, %v920_v6  ;;  %v32_v11 = vld [vmem:[%s1107_s1 + $0x20] sm:$0xff] }
   0x5   :  { %687 = vmatprep.mubr.msk.f32.mxu0 %vm76_vm1, %v30_v3  ;;  %230 = vperm.xlu0 %757, %v212_v9  }
   0x6   :  { %220 = vperm.xlu1 %755, %v210_v10  }
   0x7   :  { %9 = vsyncpa [#allocation3], 0  ;;  %v33_v13 = vld [vmem:[%s1107_s1 + $0x28] sm:$0xff]  ;;  %v34_v14 = vld [vmem:[%s1107_s1 + $0x30] sm:$0xff]  ;;  %v867_v15 = vmov 0   ;;  %vm346_vm2 = vcmask 523264  }
   0x8   :  { %688 = vmatmul.mubr.msk.f32.gmra.mrb[2].mxu0 %vm76_vm1, %v31_v8  ;;  %v35_v16 = vld [vmem:[%s1107_s1 + $0x38] sm:$0xff]  ;;  %v23_v19 = vld [vmem:[%s1109_s3 + $0x28] sm:$0xff]  ;;  %v965_v20 = vld [vmem:[%s1109_s3 + $0x20] sm:$0xff]  ;;  %v868_v29 = vmov 2   ;;  %v869_v30 = vmov 3   ;;  %v870_v31 = vmov 4  }
   0x9   :  { %690 = vmatprep.mubr.msk.f32.mxu0 %vm76_vm1, %v32_v11  ;;  %758 = vset.pattern.permute.xlu0 %v867_v15  ;;  %v21_v17 = vld [vmem:[%s1109_s3 + $0x18] sm:$0xff]  ;;  %v970_v21 = vld [vmem:[%s1109_s3 + $0x30] sm:$0xff]  ;;  %v214_v22 = vsub.f32 0.0, %v965_v20  ;;  %v215_v24 = vsub.f32 0.0, %v23_v19  ;;  %v306_v27 = vld [vmem:[%s1108_s2] sm:$0xff]  ;;  %v871_v34 = vmov 5  }
   0xa   :  { %225 = vperm.xlu1 %755, %v211_v12   ;;  %38 = vperm.xlu0 %758, %v920_v6   ;;  %v213_v18 = vsub.f32 0.0, %v21_v17  ;;  %v216_v23 = vsub.f32 0.0, %v970_v21  ;;  %v25_v25 = vld [vmem:[%s1109_s3 + $0x38] sm:$0xff]  ;;  %v308_v28 = vld [vmem:[%s1108_s2 + $0x10] sm:$0xff]  ;;  %v26_v44 = vld [vmem:[%s1109_s3] sm:$0x1] }
   0xb   :  { %v217_v26 = vsub.f32 0.0, %v25_v25  ;;  %715 = vmatprep.mubr.msk.f32.mxu1 %vm346_vm2, %v308_v28  ;;  %vm596_vm3 = vcmask 64512   ;;  %vm624_vm4 = vcmask 57344  }
   0xc   :  { %691 = vmatmul.mubr.msk.f32.gmra.mrb[4].mxu0 %vm76_vm1, %v33_v13 }
   0xd   :  { %693 = vmatprep.mubr.msk.f32.mxu0 %vm76_vm1, %v34_v14 }
   0xe   :  { %756 = vset.pattern.permute.xlu1 %v867_v15  ;;  %43 = vperm.xlu0 %758, %v925_v7  }
   0xf   :  { %53 = vperm.xlu1 %756, %v21_v17  }
  0x10   :  { %694 = vmatmul.mubr.msk.f32.gmra.mrb[6].mxu0 %vm76_vm1, %v35_v16 }
  0x11   :  { %712 = vmatprep.mubr.msk.f32.mxu0 %vm346_vm2, %v306_v27 }
  0x12   :  { %48 = vperm.xlu0 %758, %v915_v5  }
  0x13   :  { %759 = vset.pattern.permute.xlu1 %v866_v4 }
  0x14   :  { %235 = vperm.xlu1 %759, %v213_v18  }
  0x16   :  { %63 = vperm.xlu0 %758, %v23_v19  }
  0x18   :  { %760 = vset.pattern.permute.xlu1 %v867_v15 }
  0x19   :  { %58 = vperm.xlu1 %760, %v965_v20  }
  0x1a   :  { %68 = vperm.xlu0 %758, %v970_v21  }
  0x1d   :  { %761 = vset.pattern.permute.xlu1 %v866_v4 }
  0x1e   :  { %240 = vperm.xlu1 %761, %v214_v22   ;;  %763 = vset.pattern.permute.xlu0 %v866_v4 }
  0x1f   :  { %250 = vperm.xlu0 %763, %v216_v23  }
  0x22   :  { %245 = vperm.xlu1 %761, %v215_v24  }
  0x23   :  { %766 = vset.pattern.permute.xlu0 %v868_v29 }
  0x24   :  { %319 = vperm.xlu0 %766, %v925_v7  }
  0x26   :  { %762 = vset.pattern.permute.xlu1 %v867_v15 }
  0x27   :  { %73 = vperm.xlu1 %762, %v25_v25  }
  0x28   :  { %331 = vperm.xlu0 %766, %v965_v20  }
  0x2b   :  { %764 = vset.pattern.permute.xlu1 %v866_v4 }
  0x2c   :  { %255 = vperm.xlu1 %764, %v217_v26   ;;  %770 = vset.pattern.permute.xlu0 %v869_v30 }
  0x2d   :  { %481 = vperm.xlu0 %770, %v211_v12  }
  0x30   :  { %765 = vset.pattern.permute.xlu1 %v868_v29 }
  0x31   :  { %315 = vperm.xlu1 %765, %v920_v6   ;;  %493 = vperm.xlu0 %770, %v214_v22  }
  0x35   :  { %323 = vperm.xlu1 %765, %v915_v5   ;;  %773 = vset.pattern.permute.xlu0 %v868_v29 }
  0x36   :  { %343 = vperm.xlu0 %773, %v25_v25  }
  0x39   :  { %767 = vset.pattern.permute.xlu1 %v869_v30 }
  0x3a   :  { %477 = vperm.xlu1 %767, %v210_v10   ;;  %774 = vset.pattern.permute.xlu0 %v870_v31 }
  0x3b   :  { %557 = vperm.xlu0 %774, %v920_v6  }
  0x3e   :  { %768 = vset.pattern.permute.xlu1 %v868_v29 }
  0x3f   :  { %327 = vperm.xlu1 %768, %v21_v17   ;;  %569 = vperm.xlu0 %774, %v21_v17  }
  0x43   :  { %769 = vset.pattern.permute.xlu1 %v869_v30  ;;  %577 = vperm.xlu0 %774, %v23_v19  }
  0x44   :  { %485 = vperm.xlu1 %769, %v212_v9  }
  0x47   :  { %585 = vperm.xlu0 %774, %v25_v25  }
  0x48   :  { %489 = vperm.xlu1 %769, %v213_v18  }
  0x4b   :  { %777 = vset.pattern.permute.xlu0 %v871_v34 }
  0x4c   :  { %771 = vset.pattern.permute.xlu1 %v868_v29 }
  0x4d   :  { %335 = vperm.xlu1 %771, %v23_v19  }
  0x51   :  { %339 = vperm.xlu1 %771, %v970_v21  }
  0x55   :  { %772 = vset.pattern.permute.xlu1 %v869_v30 }
  0x56   :  { %497 = vperm.xlu1 %772, %v215_v24  }
  0x5a   :  { %501 = vperm.xlu1 %772, %v216_v23  }
  0x5e   :  { %505 = vperm.xlu1 %772, %v217_v26  }
  0x62   :  { %775 = vset.pattern.permute.xlu1 %v870_v31 }
  0x63   :  { %561 = vperm.xlu1 %775, %v925_v7  }
  0x67   :  { %565 = vperm.xlu1 %775, %v915_v5  }
  0x6b   :  { %573 = vperm.xlu1 %775, %v965_v20  }
  0x6f   :  { %581 = vperm.xlu1 %775, %v970_v21  }
  0x73   :  { %776 = vset.pattern.permute.xlu1 %v871_v34 }
  0x74   :  { %620 = vperm.xlu1 %776, %v26_v44  }
  0x84   :  { %v231_v36 = vpop.permute.xlu0 %230 }
  0x85   :  { %v221_v32 = vpop.permute.xlu1 %220 }
  0x89   :  { %v226_v33 = vpop.permute.xlu1 %225  ;;  %v39_v38 = vpop.permute.xlu0 %38 }
  0x8d   :  { %v44_v40 = vpop.permute.xlu0 %43 }
  0x8e   :  { %v54_v35 = vpop.permute.xlu1 %53 }
  0x91   :  { %v49_v42 = vpop.permute.xlu0 %48 }
  0x93   :  { %v236_v37 = vpop.permute.xlu1 %235 }
  0x95   :  { %v64_v49 = vpop.permute.xlu0 %63 }
  0x98   :  { %v59_v39 = vpop.permute.xlu1 %58 }
  0x99   :  { %v69_v62 = vpop.permute.xlu0 %68 }
  0x9d   :  { %v241_v41 = vpop.permute.xlu1 %240 }
  0x9e   :  { %v251_v11 = vpop.permute.xlu0 %250 }
  0xa1   :  { %v246_v48 = vpop.permute.xlu1 %245 }
  0xa6   :  { %v74_v58 = vpop.permute.xlu1 %73 }
  0xab   :  { %v256_v7 = vpop.permute.xlu1 %255 }
  0xd7   :  { %v686_v43 = vpop.f32.mrb[0].mxu0 }
  0xd8   :  { %v1002_v45 = vadd.f32 %v686_v43, %v44_v40  ;;  %v171_v46 = vpop.f32.mrb[1].mxu0 }
  0xd9   :  { %v1004_v47 = vadd.f32 %v171_v46, %v39_v38 }
  0xda   :  { %v259_v50 = vmul.f32 %v226_v33, %v1002_v45 }
  0xdb   :  { %v258_v51 = vmul.f32 %v221_v32, %v1004_v47  ;;  %v689_v52 = vpop.f32.mrb[2].mxu0 }
  0xdc   :  { %v268_v53 = vmul.f32 1.442695, %v259_v50  ;;  %v1008_v54 = vadd.f32 %v689_v52, %v54_v35  ;;  %v181_v55 = vpop.f32.mrb[3].mxu0 }
  0xdd   :  { %v266_v56 = vmul.f32 1.442695, %v258_v51  ;;  %v1010_v57 = vadd.f32 %v181_v55, %v49_v42  ;;  %v309_v55 = vld [vmem:[%s1108_s2 + $0x18] sm:$0xff] }
  0xde   :  { %778 = vpow2.f32 %v268_v53  ;;  %v261_v59 = vmul.f32 %v236_v37, %v1008_v54 }
  0xdf   :  { %780 = vpow2.f32 %v266_v56  ;;  %v260_v60 = vmul.f32 %v231_v36, %v1010_v57  ;;  %v692_v61 = vpop.f32.mrb[4].mxu0  ;;  %v310_v56 = vld [vmem:[%s1108_s2 + $0x20] sm:$0xff] }
  0xe0   :  { %v272_v63 = vmul.f32 1.442695, %v261_v59  ;;  %v1014_v0 = vadd.f32 %v692_v61, %v64_v49  ;;  %v191_v1 = vpop.f32.mrb[5].mxu0  ;;  %v313_v59 = vld [vmem:[%s1108_s2 + $0x38] sm:$0xff] }
  0xe1   :  { %v270_v2 = vmul.f32 1.442695, %v260_v60  ;;  %v192_v3 = vadd.f32 %v191_v1, %v59_v39  ;;  %v316_v60 = vpop.permute.xlu1 %315 }
  0xe2   :  { %782 = vpow2.f32 %v272_v63  ;;  %v263_v4 = vmul.f32 %v246_v48, %v1014_v0 }
  0xe3   :  { %784 = vpow2.f32 %v270_v2  ;;  %v262_v5 = vmul.f32 %v241_v41, %v192_v3  ;;  %v695_v6 = vpop.f32.mrb[6].mxu0  ;;  %v320_v2 = vpop.permute.xlu0 %319 }
  0xe4   :  { %v276_v8 = vmul.f32 1.442695, %v263_v4  ;;  %v1017_v9 = vadd.f32 %v695_v6, %v74_v58  ;;  %v201_v10 = vpop.f32.mrb[7].mxu0  ;;  %v312_v58 = vld [vmem:[%s1108_s2 + $0x30] sm:$0xff] }
  0xe5   :  { %v274_v12 = vmul.f32 1.442695, %v262_v5  ;;  %v1019_v13 = vadd.f32 %v201_v10, %v69_v62  ;;  %v324_v61 = vpop.permute.xlu1 %323 }
  0xe6   :  { %786 = vpow2.f32 %v276_v8  ;;  %v265_v14 = vmul.f32 %v256_v7, %v1017_v9 }
  0xe7   :  { %788 = vpow2.f32 %v274_v12  ;;  %v264_v15 = vmul.f32 %v251_v11, %v1019_v13  ;;  %v332_v4 = vpop.permute.xlu0 %331 }
  0xe8   :  { %v779_v16 = vpop.eup %778  ;;  %v280_v17 = vmul.f32 1.442695, %v265_v14 }
  0xe9   :  { %v781_v18 = vpop.eup %780  ;;  %v283_v19 = vadd.f32 1.0, %v779_v16  ;;  %v278_v20 = vmul.f32 1.442695, %v264_v15  ;;  %v478_v62 = vpop.permute.xlu1 %477 }
  0xea   :  { %v282_v21 = vadd.f32 1.0, %v781_v18  ;;  %790 = vpow2.f32 %v280_v17 }
  0xeb   :  { %792 = vrcp.f32 %v283_v19  ;;  %v482_v6 = vpop.permute.xlu0 %481 }
  0xec   :  { %v783_v22 = vpop.eup %782  ;;  %794 = vrcp.f32 %v282_v21 }
  0xed   :  { %v785_v23 = vpop.eup %784  ;;  %v285_v24 = vadd.f32 1.0, %v783_v22  ;;  %796 = vpow2.f32 %v278_v20  ;;  %v328_v63 = vpop.permute.xlu1 %327 }
  0xee   :  { %v284_v25 = vadd.f32 1.0, %v785_v23 }
  0xef   :  { %798 = vrcp.f32 %v285_v24  ;;  %v494_v8 = vpop.permute.xlu0 %493 }
  0xf0   :  { %v787_v26 = vpop.eup %786  ;;  %800 = vrcp.f32 %v284_v25 }
  0xf1   :  { %v789_v27 = vpop.eup %788  ;;  %v287_v28 = vadd.f32 1.0, %v787_v26 }
  0xf2   :  { %v286_v29 = vadd.f32 1.0, %v789_v27 }
  0xf3   :  { %802 = vrcp.f32 %v287_v28 }
  0xf4   :  { %v791_v30 = vpop.eup %790  ;;  %804 = vrcp.f32 %v286_v29 }
  0xf5   :  { %v793_v31 = vpop.eup %792  ;;  %v289_v32 = vadd.f32 1.0, %v791_v30  ;;  %v344_v30 = vpop.permute.xlu0 %343 }
  0xf6   :  { %v795_v33 = vpop.eup %794  ;;  %v299_v34 = vmul.f32 %v793_v31, %v1002_v45 }
  0xf7   :  { %v797_v35 = vpop.eup %796  ;;  %v298_v36 = vmul.f32 %v795_v33, %v1004_v47  ;;  %806 = vrcp.f32 %v289_v32 }
  0xf8   :  { %v288_v37 = vadd.f32 1.0, %v797_v35 }
  0xf9   :  { %v799_v38 = vpop.eup %798  ;;  %v724_v39 = vpack.c.bf16 %v299_v34, %v298_v36 }
  0xfa   :  { %v801_v40 = vpop.eup %800  ;;  %v301_v41 = vmul.f32 %v799_v38, %v1008_v54  ;;  %808 = vrcp.f32 %v288_v37  ;;  %v307_v54 = vld [vmem:[%s1108_s2 + $0x8] sm:$0xff] }
  0xfb   :  { %v300_v42 = vmul.f32 %v801_v40, %v1010_v57  ;;  %725 = vmatprep.subr.bf16.mxu0 %v724_v39  ;;  %740 = vmatprep.subr.bf16.mxu1 %v724_v39  ;;  %v311_v57 = vld [vmem:[%s1108_s2 + $0x28] sm:$0xff]  ;;  %s872_s2 = smov [#allocation2]  }
  0xfc   :  { %727 = vmatpush3.bf16.msra.mxu0 %v724_v39  ;;  %744 = vmatpush3.bf16.msra.mxu1 %v724_v39  ;;  %s632_s11 = sshll.u32 %s872_s2, 4  ;;  %s633_s11 = int_to_ptr.vmem [resolvable:$true] %s632_s11 }
  0xfd   :  { %v803_v43 = vpop.eup %802  ;;  %v728_v44 = vpack.c.bf16 %v301_v41, %v300_v42  ;;  %s842_s12 = scalar_lea.vmem %s633_s11, 16  ;;  %s846_s13 = scalar_lea.vmem %s633_s11, 32 }
  0xfe   :  { %v805_v45 = vpop.eup %804  ;;  %v303_v46 = vmul.f32 %v803_v43, %v1014_v0  ;;  %v486_v0 = vpop.permute.xlu1 %485  ;;  %p843_p0 = scmp.ne.s32.totalorder %s633_s11, %s842_s12  ;;  %p847_p1 = scmp.lt.s32.totalorder %s633_s11, %s633_s11 }
  0xff   :  { %v302_v47 = vmul.f32 %v805_v45, %v192_v3  ;;  %729 = vmatprep.subr.bf16.mxu0 %v728_v44  ;;  %741 = vmatprep.subr.bf16.mxu1 %v728_v44  ;;  %p848_p2 = scmp.lt.s32.totalorder %s846_s13, %s842_s12 }
 0x100   :  { %731 = vmatpush3.bf16.msra.mxu0 %v728_v44  ;;  %745 = vmatpush3.bf16.msra.mxu1 %v728_v44 }
 0x101   :  { %v807_v48 = vpop.eup %806  ;;  %v732_v49 = vpack.c.bf16 %v303_v46, %v302_v47  ;;  %p849_p3 = por %p848_p2, %p847_p1 }
 0x102   :  { %v305_v50 = vmul.f32 %v807_v48, %v1017_v9  ;;  %v490_v1 = vpop.permute.xlu1 %489 }
 0x103   :  { %733 = vmatprep.subr.bf16.mxu0 %v732_v49  ;;  %742 = vmatprep.subr.bf16.mxu1 %v732_v49  ;;  %p850_p4 = pnand %p849_p3, %p843_p0 }
 0x104   :  { %v809_v51 = vpop.eup %808  ;;  %735 = vmatpush3.bf16.msra.mxu0 %v732_v49  ;;  %746 = vmatpush3.bf16.msra.mxu1 %v732_v49 }
 0x105   :  { %v304_v52 = vmul.f32 %v809_v51, %v1019_v13 }
 0x106   :  { %v336_v3 = vpop.permute.xlu1 %335 }
 0x107   :  { %v736_v53 = vpack.c.bf16 %v305_v50, %v304_v52 }
 0x109   :  { %737 = vmatprep.subr.bf16.mxu0 %v736_v53  ;;  %743 = vmatprep.subr.bf16.mxu1 %v736_v53 }
 0x10a   :  { %739 = vmatpush3.bf16.msra.mxu0 %v736_v53  ;;  %747 = vmatpush3.bf16.msra.mxu1 %v736_v53  ;;  %v340_v5 = vpop.permute.xlu1 %339 }
 0x10d   :  { %713 = vmatmul.mubr.msk.f32.vlgmr.msra.gmra.mrb[8].mxu0 %vm346_vm2, %v307_v54  ;;  %716 = vmatmul.mubr.msk.f32.vlgmr.msra.gmra.mrb[0].mxu1 %vm346_vm2, %v309_v55 }
 0x10e   :  { %718 = vmatprep.mubr.msk.f32.mxu1 %vm346_vm2, %v310_v56  ;;  %v498_v7 = vpop.permute.xlu1 %497 }
 0x111   :  { %719 = vmatmul.mubr.msk.f32.gmra.mrb[2].mxu1 %vm346_vm2, %v311_v57 }
 0x112   :  { %721 = vmatprep.mubr.msk.f32.mxu1 %vm346_vm2, %v312_v58  ;;  %v502_v22 = vpop.permute.xlu1 %501 }
 0x115   :  { %722 = vmatmul.mubr.msk.f32.gmra.mrb[4].mxu1 %vm346_vm2, %v313_v59 }
 0x116   :  { %v506_v38 = vpop.permute.xlu1 %505 }
 0x11a   :  { %v562_v56 = vpop.permute.xlu1 %561 }
 0x1e0   :  { %v714_v9 = vpop.f32.mrb[8].mxu0  ;;  %v717_v10 = vpop.f32.mrb[0].mxu1 }
 0x1e1   :  { %v1054_v11 = vadd.f32 %v714_v9, %v320_v2  ;;  %v1056_v12 = vadd.f32 %v717_v10, %v328_v63  ;;  %v437_v13 = vpop.f32.mrb[9].mxu0  ;;  %v447_v14 = vpop.f32.mrb[1].mxu1 }
 0x1e2   :  { %v1058_v15 = vadd.f32 %v437_v13, %v316_v60  ;;  %v1060_v16 = vadd.f32 %v447_v14, %v324_v61  ;;  %v558_v60 = vpop.permute.xlu0 %557  ;;  %v566_v63 = vpop.permute.xlu1 %565 }
 0x1e3   :  { %v509_v17 = vmul.f32 %v482_v6, %v1054_v11  ;;  %v511_v18 = vmul.f32 %v490_v1, %v1056_v12 }
 0x1e4   :  { %v508_v19 = vmul.f32 %v478_v62, %v1058_v15  ;;  %v510_v20 = vmul.f32 %v486_v0, %v1060_v16  ;;  %v720_v21 = vpop.f32.mrb[2].mxu1 }
 0x1e5   :  { %v518_v23 = vmul.f32 1.442695, %v509_v17  ;;  %v522_v24 = vmul.f32 1.442695, %v511_v18  ;;  %v1066_v25 = vadd.f32 %v720_v21, %v336_v3  ;;  %v457_v26 = vpop.f32.mrb[3].mxu1 }
 0x1e6   :  { %v516_v27 = vmul.f32 1.442695, %v508_v19  ;;  %v520_v28 = vmul.f32 1.442695, %v510_v20  ;;  %v1068_v29 = vadd.f32 %v457_v26, %v332_v4  ;;  %v570_v3 = vpop.permute.xlu0 %569 }
 0x1e7   :  { %810 = vpow2.f32 %v518_v23  ;;  %v513_v31 = vmul.f32 %v498_v7, %v1066_v25 }
 0x1e8   :  { %812 = vpow2.f32 %v522_v24  ;;  %v512_v32 = vmul.f32 %v494_v8, %v1068_v29  ;;  %v723_v33 = vpop.f32.mrb[4].mxu1 }
 0x1e9   :  { %814 = vpow2.f32 %v516_v27  ;;  %v526_v34 = vmul.f32 1.442695, %v513_v31  ;;  %v1072_v35 = vadd.f32 %v723_v33, %v344_v30  ;;  %v467_v36 = vpop.f32.mrb[5].mxu1 }
 0x1ea   :  { %816 = vpow2.f32 %v520_v28  ;;  %v524_v37 = vmul.f32 1.442695, %v512_v32  ;;  %v1074_v39 = vadd.f32 %v467_v36, %v340_v5  ;;  %v578_v23 = vpop.permute.xlu0 %577 }
 0x1eb   :  { %818 = vpow2.f32 %v526_v34  ;;  %v515_v40 = vmul.f32 %v506_v38, %v1072_v35 }
 0x1ec   :  { %820 = vpow2.f32 %v524_v37  ;;  %v514_v41 = vmul.f32 %v502_v22, %v1074_v39 }
 0x1ed   :  { %v530_v42 = vmul.f32 1.442695, %v515_v40 }
 0x1ee   :  { %v528_v43 = vmul.f32 1.442695, %v514_v41  ;;  %v586_v36 = vpop.permute.xlu0 %585 }
 0x1ef   :  { %822 = vpow2.f32 %v530_v42 }
 0x1f0   :  { %824 = vpow2.f32 %v528_v43 }
 0x1f1   :  { %v811_v44 = vpop.eup %810 }
 0x1f2   :  { %v813_v45 = vpop.eup %812  ;;  %v533_v46 = vadd.f32 1.0, %v811_v44 }
 0x1f3   :  { %v815_v47 = vpop.eup %814  ;;  %v535_v48 = vadd.f32 1.0, %v813_v45 }
 0x1f4   :  { %v817_v49 = vpop.eup %816  ;;  %826 = vrcp.f32 %v533_v46  ;;  %v532_v50 = vadd.f32 1.0, %v815_v47 }
 0x1f5   :  { %v819_v51 = vpop.eup %818  ;;  %828 = vrcp.f32 %v535_v48  ;;  %v534_v52 = vadd.f32 1.0, %v817_v49 }
 0x1f6   :  { %v821_v53 = vpop.eup %820  ;;  %830 = vrcp.f32 %v532_v50  ;;  %v537_v54 = vadd.f32 1.0, %v819_v51 }
 0x1f7   :  { %832 = vrcp.f32 %v534_v52  ;;  %v536_v55 = vadd.f32 1.0, %v821_v53 }
 0x1f8   :  { %834 = vrcp.f32 %v537_v54 }
 0x1f9   :  { %v823_v57 = vpop.eup %822  ;;  %836 = vrcp.f32 %v536_v55 }
 0x1fa   :  { %v825_v58 = vpop.eup %824  ;;  %v539_v59 = vadd.f32 1.0, %v823_v57 }
 0x1fb   :  { %v538_v61 = vadd.f32 1.0, %v825_v58 }
 0x1fc   :  { %838 = vrcp.f32 %v539_v59 }
 0x1fd   :  { %840 = vrcp.f32 %v538_v61 }
 0x1fe   :  { %v827_v62 = vpop.eup %826 }
 0x1ff   :  { %v829_v0 = vpop.eup %828  ;;  %v549_v1 = vmul.f32 %v827_v62, %v1054_v11  ;;  %v574_v11 = vpop.permute.xlu1 %573 }
 0x200   :  { %v831_v2 = vpop.eup %830  ;;  %v551_v7 = vmul.f32 %v829_v0, %v1056_v12 }
 0x201   :  { %v833_v4 = vpop.eup %832  ;;  %v589_v5 = vmul.f32 %v562_v56, %v549_v1  ;;  %v548_v6 = vmul.f32 %v831_v2, %v1058_v15 }
 0x202   :  { %v835_v8 = vpop.eup %834  ;;  %v550_v9 = vmul.f32 %v833_v4, %v1060_v16  ;;  %v591_v20 = vmul.f32 %v570_v3, %v551_v7 }
 0x203   :  { %v837_v10 = vpop.eup %836  ;;  %v598_v13 = vsel %vm596_vm3, %v589_v5, 0.0  ;;  %v588_v14 = vmul.f32 %v558_v60, %v548_v6  ;;  %v553_v21 = vmul.f32 %v835_v8, %v1066_v25  ;;  %v582_v32 = vpop.permute.xlu1 %581 }
 0x204   :  { %v590_v17 = vmul.f32 %v566_v63, %v550_v9  ;;  %v552_v18 = vmul.f32 %v837_v10, %v1068_v29  ;;  %v602_v28 = vsel %vm596_vm3, %v591_v20, 0.0 }
 0x205   :  { %v597_v19 = vsel %vm596_vm3, %v588_v14, 0.0  ;;  %v593_v30 = vmul.f32 %v578_v23, %v553_v21 }
 0x206   :  { %v839_v22 = vpop.eup %838  ;;  %v599_v15 = vadd.f32 %v598_v13, %v597_v19  ;;  %v600_v24 = vsel %vm596_vm3, %v590_v17, 0.0  ;;  %v592_v16 = vmul.f32 %v574_v11, %v552_v18 }
 0x207   :  { %v841_v12 = vpop.eup %840  ;;  %v555_v29 = vmul.f32 %v839_v22, %v1072_v35  ;;  %v606_v37 = vsel %vm596_vm3, %v593_v30, 0.0  ;;  %v621_v48 = vpop.permute.xlu1 %620 }
 0x208   :  { %v601_v26 = vadd.f32 %v600_v24, %v599_v15  ;;  %v554_v27 = vmul.f32 %v841_v12, %v1074_v39  ;;  %v604_v33 = vsel %vm596_vm3, %v592_v16, 0.0 }
 0x209   :  { %v595_v38 = vmul.f32 %v586_v36, %v555_v29 }
 0x20a   :  { %v603_v31 = vadd.f32 %v602_v28, %v601_v26  ;;  %v594_v25 = vmul.f32 %v582_v32, %v554_v27 }
 0x20b   :  { %v610_v39 = vsel %vm596_vm3, %v595_v38, 0.0 }
 0x20c   :  { %v605_v34 = vadd.f32 %v604_v33, %v603_v31  ;;  %v608_v41 = vsel %vm596_vm3, %v594_v25, 0.0 }
 0x20e   :  { %v607_v40 = vadd.f32 %v606_v37, %v605_v34 }
 0x210   :  { %v609_v42 = vadd.f32 %v608_v41, %v607_v40 }
 0x212   :  { %v611_v43 = vadd.f32 %v610_v39, %v609_v42 }
 0x214   :  { %v612_v44 = vrot.slane %v611_v43, 4 }
 0x216   :  { %v613_v45 = vadd.f32 %v612_v44, %v611_v43 }
 0x218   :  { %v614_v35 = vrot.slane %v613_v45, 2 }
 0x21a   :  { %v615_v46 = vadd.f32 %v614_v35, %v613_v45 }
 0x21c   :  { %v616_v47 = vrot.slane %v615_v46, 1 }
 0x21e   :  { %v617_v49 = vadd.f32 %v616_v47, %v615_v46 }
 0x220   :  { %v623_v50 = vadd.f32 %v621_v48, %v617_v49 }
 0x222   :  { %625 = vst.msk [vmem:[#allocation2] sm:$0x1] %vm624_vm4, %v623_v50 }
 0x223   :  { %853 = shalt.err (!%p850_p4)
}
 0x224   :  { %s854_s1 = scalar_lea.hbm %s1110_s4, 16 }
 0x225   :  { %p855_p5 = scmp.ne.s32.totalorder %s1110_s4, %s854_s1  ;;  %p858_p6 = scmp.lt.u32.totalorder %s854_s1, %s1110_s4 }
 0x227   :  { %p860_p7 = pnand %p858_p6, %p855_p5 }
 0x229   :  { %863 = shalt.err (!%p860_p7)
}
 0x22a   :  { %635 = dma.vmem_to_hbm [thread:$0]  %s633_s11, 16, %s1110_s4, [#allocation3]  }
 0x22b   :  { %864 = dma.done.wait [#allocation3], 16  }
 0x22c   :  { %865 = vsyncadd [#allocation3], 4294967280 }
 0x22d   :  { %639 = vsyncpa [#allocation3], 1 }

</bundles_post_ra>
